<compile_context>
chip_gen: v5e
topology: v5e:2x2
jax: 0.10.0
libtpu: 0.0.40
codegen_flags: <defaults>
</compile_context>

<pallas_src>
import functools

import jax
import jax.numpy as jnp
from jax.experimental import pallas as pl
from jax.experimental.pallas import tpu as pltpu


PAD_ENTITY_ID = 31161


# ----------------------------------------------------------------------------
# Tiling / entity-table preparation (done once, at parameter-load time)
# ----------------------------------------------------------------------------
def _round_up(x, m):
    return ((x + m - 1) // m) * m


def _choose_tiling(n, *, cap=16384, min_steps=4):
    """Entity-tile width and padded table width.

    - tn is a multiple of 128 (lane-dense minor dim of the streamed block).
    - At least `min_steps` grid steps when n allows it, so v7x's two
      TensorCores each get >= 2 pipelined steps on the 'parallel' axis
      (also keeps single-core v5e/v6e double-buffering effective).
    - Capped so the double-buffered (D, tn) bf16 block stays small in VMEM.
    """
    tn = min(cap, _round_up(pl.cdiv(n, min_steps), 128))
    tn = max(tn, 128)
    n_pad = _round_up(n, tn)
    return tn, n_pad


def prepare_entity_table(all_entity_embeds, store_dtype=jnp.bfloat16):
    """One-time prep of the (static) entity table for the scores GEMM.

    Cast to bf16 (halves HBM bytes streamed per forward; f32 accumulation is
    kept in-kernel), transpose to (D, N) so tiles are lane-dense, and pad N up
    to the tile grid (zero columns, sliced off the output).  In production,
    call this once when the checkpoint is loaded, NOT inside the jitted step.
    """
    n, d = all_entity_embeds.shape
    _, n_pad = _choose_tiling(n)
    table_t = jnp.transpose(all_entity_embeds).astype(store_dtype)     # (D, N)
    if n_pad != n:
        table_t = jnp.pad(table_t, ((0, 0), (0, n_pad - n)))
    return table_t                                                     # (D, Np)


# ----------------------------------------------------------------------------
# Fused kernel: user_vector (recomputed per step) + streaming scores GEMM
# ----------------------------------------------------------------------------
def rec_kernel(ids_ref, h_ref, a_ref, b_ref, token0_ref, projw_ref, projb_ref,
               ent_ref, bias_ref, out_ref, *, pad_id):
    h = h_ref[...]                                   # (B, S, D) f32
    B, S, D = h.shape
    Da = a_ref.shape[1]

    # --- SelfAttentionSeq: e = tanh(h @ a) @ b (flat MXU push + lane reduce)
    t = jnp.tanh(jnp.dot(h.reshape(B * S, D), a_ref[...],
                         preferred_element_type=jnp.float32))          # (B*S, Da)
    e = jnp.sum(t.reshape(B, S, Da) * b_ref[...], axis=-1)             # (B, S)

    # --- additive mask (pad tokens -> -1e30; all-padded row -> no mask)
    mask = ids_ref[...] == pad_id                                      # (B, S)
    full_mask = -1e30 * mask.astype(jnp.float32)
    batch_mask = (jnp.sum((~mask).astype(jnp.int32), axis=-1,
                          keepdims=True) > 0).astype(jnp.float32)      # (B, 1)
    e = e + full_mask * batch_mask

    # --- softmax over the sequence axis
    e_max = jnp.max(e, axis=-1, keepdims=True)
    p = jnp.exp(e - e_max)
    inv = pl.reciprocal(jnp.sum(p, axis=-1, keepdims=True))            # exact; EUP
    attn = p * inv                                                     # (B, S)

    # --- attention-weighted pooling
    pooled = jnp.sum(attn[..., None] * h, axis=1)                      # (B, D)

    # --- word_vector = entity_projection(token_embeds[:, 0, :])
    # projw keeps the PyTorch (out, in) layout; contract the 'in' dims.
    word = jax.lax.dot_general(
        token0_ref[...], projw_ref[...],
        dimension_numbers=(((1,), (1,)), ((), ())),
        preferred_element_type=jnp.float32) + projb_ref[...]           # (B, D)

    # --- user_vector = 0.8 * pooled + 0.2 * word_vector
    uv = 0.8 * pooled + 0.2 * word                                     # (B, D) f32

    # --- streamed scores tile: (B, D) @ (D, tn) bf16 inputs, f32 accumulation
    ent = ent_ref[...]                                                 # (D, tn)
    out_ref[...] = (jnp.dot(uv.astype(ent.dtype), ent,
                            preferred_element_type=jnp.float32)
                    + bias_ref[...]).astype(out_ref.dtype)


def rec_forward_fused(h, ids, a, b, token0, proj_w, proj_b,
                      ent_table_t, rec_bias, n_entities, pad_id):
    B, S, D = h.shape
    Da = a.shape[1]
    WD = token0.shape[1]
    Dt, Np = ent_table_t.shape
    assert Dt == D
    tn, n_pad = _choose_tiling(n_entities)
    assert n_pad == Np, "entity table must come from prepare_entity_table()"
    n_steps = Np // tn

    b_row = b.reshape(1, Da)                    # (Da, 1) -> lane-friendly row
    proj_b2 = proj_b.reshape(1, D)
    bias_pad = jnp.pad(rec_bias.reshape(1, n_entities),
                       ((0, 0), (0, Np - n_entities)))                 # (1, Np)

    ent_bytes = Np * D * jnp.dtype(ent_table_t.dtype).itemsize
    flops_per_step = 2 * B * tn * D + 2 * B * S * D * Da + 2 * B * WD * D
    cost = pl.CostEstimate(
        flops=flops_per_step * n_steps,
        transcendentals=(B * S * Da + B * S) * n_steps,
        bytes_accessed=ent_bytes + B * Np * 4 + B * S * D * 4 + D * WD * 4,
    )

    kernel = functools.partial(rec_kernel, pad_id=pad_id)
    scores_padded = pl.pallas_call(
        kernel,
        out_shape=jax.ShapeDtypeStruct((B, Np), jnp.float32),
        grid_spec=pl.GridSpec(
            grid=(n_steps,),
            in_specs=[
                pl.BlockSpec((B, S), lambda j: (0, 0)),        # entity ids
                pl.BlockSpec((B, S, D), lambda j: (0, 0, 0)),  # entity embeds
                pl.BlockSpec((D, Da), lambda j: (0, 0)),       # attn a
                pl.BlockSpec((1, Da), lambda j: (0, 0)),       # attn b (row)
                pl.BlockSpec((B, WD), lambda j: (0, 0)),       # token[:,0,:]
                pl.BlockSpec((D, WD), lambda j: (0, 0)),       # proj_w (out,in)
                pl.BlockSpec((1, D), lambda j: (0, 0)),        # proj_b
                # Lane-dense, sublane-aligned (D % 8 == 0) entity tile.
                # TODO(synk): add pipeline_mode=pl.Buffered(3) only if a trace
                # shows exposed DMA at step boundaries after enlarging tn.
                pl.BlockSpec((D, tn), lambda j: (0, j)),       # entity tile
                pl.BlockSpec((1, tn), lambda j: (0, j)),       # bias tile
            ],
            out_specs=pl.BlockSpec((B, tn), lambda j: (0, j)),
        ),
        compiler_params=pltpu.CompilerParams(
            dimension_semantics=("parallel",),       # split N across v7x TCs
            vmem_limit_bytes=32 * 1024 * 1024),      # raise v5e's 16 MiB default
        cost_estimate=cost,
    )(ids, h, a, b_row, token0, proj_w, proj_b2, ent_table_t, bias_pad)
    return scores_padded[:, :n_entities]


# ----------------------------------------------------------------------------
# Model wrapper (parameter container + forward)
# ----------------------------------------------------------------------------
def init_params(key, entity_dim, word_dim, n_entities):
    D, WD, N = entity_dim, word_dim, n_entities
    ks = jax.random.split(key, 8)

    def xavier(k, shape, gain=1.414):
        fan_in, fan_out = shape[0], shape[1]
        bound = gain * (6.0 / (fan_in + fan_out)) ** 0.5
        return jax.random.uniform(k, shape, jnp.float32, -bound, bound)

    def unif(k, shape, bound):
        return jax.random.uniform(k, shape, jnp.float32, -bound, bound)

    return dict(
        attn1_a=xavier(ks[0], (D, D)),
        attn1_b=xavier(ks[1], (D, 1)),
        # attn_layer_2 / GateLayer params exist in the module but their
        # outputs are dead code in forward -> kept only for fidelity.
        attn2_a=xavier(ks[2], (D, D)),
        attn2_b=xavier(ks[3], (D, 1)),
        # rec_bias: only the bias of nn.Linear(hidden, n_entities) is used.
        rec_bias_b=unif(ks[4], (N,), 1.0 / D ** 0.5),
        proj_w=unif(ks[5], (D, WD), 1.0 / WD ** 0.5),   # (out, in) PyTorch layout
        proj_b=unif(ks[6], (D,), 1.0 / WD ** 0.5),
    )


def forward(params, token_embeds, entity_embeds, ent_table_t,
            retrieved_entity_ids, retrieved_entity_embeds, entity_ids,
            *, n_entities):
    # NOTE: the original module also computes attn_layer_2(retrieved_entity_embeds)
    # but never uses the result -> dead code, intentionally not launched.
    del retrieved_entity_ids, retrieved_entity_embeds
    token0 = token_embeds[:, 0, :]                     # CLS token slice
    return rec_forward_fused(
        entity_embeds, entity_ids,
        params["attn1_a"], params["attn1_b"],
        token0, params["proj_w"], params["proj_b"],
        ent_table_t, params["rec_bias_b"], n_entities, PAD_ENTITY_ID)


# ----------------------------------------------------------------------------
# Pure-JAX references for validation
# ----------------------------------------------------------------------------
def ref_attn(h, ids, a, b, pad_id):
    mask = ids == pad_id
    e = jnp.matmul(jnp.tanh(jnp.matmul(h, a)), b)
    full_mask = -1e30 * mask.astype(jnp.float32)
    batch_mask = (jnp.sum(~mask, axis=-1) > 0).astype(jnp.float32)[:, None]
    e = e + (full_mask * batch_mask)[..., None]
    attn = jax.nn.softmax(e, axis=1)
    return jnp.squeeze(jnp.matmul(jnp.swapaxes(attn, 1, 2), h), 1)


def ref_forward(params, token_embeds, entity_embeds, all_entity_embeds,
                retrieved_entity_ids, retrieved_entity_embeds, entity_ids,
                store_dtype=jnp.float32):
    user_vector = ref_attn(entity_embeds, entity_ids,
                           params["attn1_a"], params["attn1_b"], PAD_ENTITY_ID)
    word_vector = token_embeds[:, 0, :] @ params["proj_w"].T + params["proj_b"]
    user_vector = 0.8 * user_vector + 0.2 * word_vector
    uv = user_vector.astype(store_dtype)
    tbl = all_entity_embeds.astype(store_dtype)
    return (jnp.dot(uv, tbl.T, preferred_element_type=jnp.float32)
            + params["rec_bias_b"])


# ----------------------------------------------------------------------------
if __name__ == "__main__":
    B, T = 2, 4
    entity_dim, word_dim = 32, 64
    S1, S2 = 8, 8
    n_entities = 512       # small demo table; production N ~ 31162 also tiles

    key = jax.random.PRNGKey(0)
    k_param, k_tok, k_ent, k_ret, k_all, k_id1, k_id2 = jax.random.split(key, 7)

    params = init_params(k_param, entity_dim, word_dim, n_entities)

    token_embeds = jax.random.normal(k_tok, (B, T, word_dim), jnp.float32)
    entity_embeds = jax.random.normal(k_ent, (B, S1, entity_dim), jnp.float32)
    retrieved_entity_embeds = jax.random.normal(k_ret, (B, S2, entity_dim),
                                                jnp.float32)
    all_entity_embeds = jax.random.normal(k_all, (n_entities, entity_dim),
                                          jnp.float32)

    entity_ids = jax.random.randint(k_id1, (B, S1), 0, 100, jnp.int32)
    entity_ids = entity_ids.at[:, -2:].set(PAD_ENTITY_ID)       # some padding
    retrieved_entity_ids = jax.random.randint(k_id2, (B, S2), 0, 100, jnp.int32)
    retrieved_entity_ids = retrieved_entity_ids.at[:, -3:].set(PAD_ENTITY_ID)

    # One-time (load-time) prep: bf16, transposed to (D, N), padded to the tile grid.
    ent_table_t = prepare_entity_table(all_entity_embeds)

    fwd = jax.jit(functools.partial(forward, n_entities=n_entities))
    scores = fwd(params, token_embeds, entity_embeds, ent_table_t,
                 retrieved_entity_ids, retrieved_entity_embeds, entity_ids)
    scores = jax.block_until_ready(scores)
    assert scores.shape == (B, n_entities)

    # Check 1: against a reference using the same bf16-stored table/user-vector
    # (isolates kernel correctness from intentional quantization).
    ref_bf = ref_forward(params, token_embeds, entity_embeds, all_entity_embeds,
                         retrieved_entity_ids, retrieved_entity_embeds,
                         entity_ids, store_dtype=jnp.bfloat16)
    assert jnp.allclose(scores, ref_bf, rtol=2e-2, atol=2e-2), (
        float(jnp.max(jnp.abs(scores - ref_bf))))

    # Check 2: against the full-f32 module semantics (looser tolerance covers
    # the intentional bf16 storage of the entity table / user vector).
    ref_fp = ref_forward(params, token_embeds, entity_embeds, all_entity_embeds,
                         retrieved_entity_ids, retrieved_entity_embeds,
                         entity_ids, store_dtype=jnp.float32)
    assert jnp.allclose(scores, ref_fp, rtol=5e-2, atol=1e-1), (
        float(jnp.max(jnp.abs(scores - ref_fp))))

    print("KERNEL_OK")
</pallas_src>

<mosaic_0001>
module attributes {stable_mosaic.version = 11 : i64} {
  func.func @rec_kernel(%arg0: i32, %arg1: memref<2x8xi32, #tpu.memory_space<vmem>>, %arg2: memref<2x8x32xf32, #tpu.memory_space<vmem>>, %arg3: memref<32x32xf32, #tpu.memory_space<vmem>>, %arg4: memref<1x32xf32, #tpu.memory_space<vmem>>, %arg5: memref<2x64xf32, #tpu.memory_space<vmem>>, %arg6: memref<32x64xf32, #tpu.memory_space<vmem>>, %arg7: memref<1x32xf32, #tpu.memory_space<vmem>>, %arg8: memref<32x128xbf16, #tpu.memory_space<vmem>>, %arg9: memref<1x128xf32, #tpu.memory_space<vmem>>, %arg10: memref<2x128xf32, #tpu.memory_space<vmem>>) attributes {dimension_semantics = [#tpu.dimension_semantics<parallel>], iteration_bounds = array<i64: 4>, scalar_prefetch = 0 : i64, scratch_operands = 0 : i64, tpu.core_type = #tpu.core_type<tc>, window_params = [{pipeline_mode = #tpu.pipeline_mode<synchronous>, transform_indices = @transform_0, window_bounds = array<i64: 2, 8>}, {pipeline_mode = #tpu.pipeline_mode<synchronous>, transform_indices = @transform_1, window_bounds = array<i64: 2, 8, 32>}, {pipeline_mode = #tpu.pipeline_mode<synchronous>, transform_indices = @transform_2, window_bounds = array<i64: 32, 32>}, {pipeline_mode = #tpu.pipeline_mode<synchronous>, transform_indices = @transform_3, window_bounds = array<i64: 1, 32>}, {pipeline_mode = #tpu.pipeline_mode<synchronous>, transform_indices = @transform_4, window_bounds = array<i64: 2, 64>}, {pipeline_mode = #tpu.pipeline_mode<synchronous>, transform_indices = @transform_5, window_bounds = array<i64: 32, 64>}, {pipeline_mode = #tpu.pipeline_mode<synchronous>, transform_indices = @transform_6, window_bounds = array<i64: 1, 32>}, {transform_indices = @transform_7, window_bounds = array<i64: 32, 128>}, {transform_indices = @transform_8, window_bounds = array<i64: 1, 128>}, {transform_indices = @transform_9, window_bounds = array<i64: 2, 128>}]} {
    %c0 = arith.constant 0 : index
    %c0_0 = arith.constant 0 : index
    %c0_1 = arith.constant 0 : index
    %0 = vector.load %arg2[%c0, %c0_0, %c0_1] : memref<2x8x32xf32, #tpu.memory_space<vmem>>, vector<2x8x32xf32>
    %1 = vector.shape_cast %0 : vector<2x8x32xf32> to vector<16x32xf32>
    %c0_2 = arith.constant 0 : index
    %c0_3 = arith.constant 0 : index
    %2 = vector.load %arg3[%c0_2, %c0_3] : memref<32x32xf32, #tpu.memory_space<vmem>>, vector<32x32xf32>
    %cst = arith.constant dense<0.000000e+00> : vector<16x32xf32>
    %3 = tpu.matmul %1, %2, %cst {dimension_numbers = #tpu.dot_dimension_numbers<[1], [0], [0], [1], [0, 0, 1, 1], [], []>} : vector<16x32xf32>, vector<32x32xf32>, vector<16x32xf32> -> vector<16x32xf32>
    %4 = math.tanh %3 : vector<16x32xf32>
    %5 = vector.shape_cast %4 : vector<16x32xf32> to vector<2x8x32xf32>
    %c0_4 = arith.constant 0 : index
    %c0_5 = arith.constant 0 : index
    %6 = vector.load %arg4[%c0_4, %c0_5] : memref<1x32xf32, #tpu.memory_space<vmem>>, vector<1x32xf32>
    %7 = vector.shape_cast %6 : vector<1x32xf32> to vector<1x1x32xf32>
    %8 = vector.broadcast %7 : vector<1x1x32xf32> to vector<2x8x32xf32>
    %9 = arith.mulf %5, %8 : vector<2x8x32xf32>
    %cst_6 = arith.constant dense<0.000000e+00> : vector<2x8xf32>
    %10 = vector.multi_reduction <add>, %9, %cst_6 [2] : vector<2x8x32xf32> to vector<2x8xf32>
    %c0_7 = arith.constant 0 : index
    %c0_8 = arith.constant 0 : index
    %11 = vector.load %arg1[%c0_7, %c0_8] : memref<2x8xi32, #tpu.memory_space<vmem>>, vector<2x8xi32>
    %c31161_i32 = arith.constant 31161 : i32
    %12 = vector.broadcast %c31161_i32 : i32 to vector<2x8xi32>
    %13 = arith.cmpi eq, %11, %12 : vector<2x8xi32>
    %14 = arith.extui %13 : vector<2x8xi1> to vector<2x8xi32>
    %15 = arith.sitofp %14 : vector<2x8xi32> to vector<2x8xf32>
    %cst_9 = arith.constant -1.000000e+30 : f32
    %16 = vector.broadcast %cst_9 : f32 to vector<2x8xf32>
    %17 = arith.mulf %16, %15 : vector<2x8xf32>
    %cst_10 = arith.constant dense<true> : vector<2x8xi1>
    %18 = arith.xori %13, %cst_10 : vector<2x8xi1>
    %19 = arith.extui %18 : vector<2x8xi1> to vector<2x8xi32>
    %cst_11 = arith.constant dense<0> : vector<2xi32>
    %20 = vector.multi_reduction <add>, %19, %cst_11 [1] : vector<2x8xi32> to vector<2xi32>
    %21 = vector.shape_cast %20 : vector<2xi32> to vector<2x1xi32>
    %c0_i32 = arith.constant 0 : i32
    %22 = vector.broadcast %c0_i32 : i32 to vector<2x1xi32>
    %23 = arith.cmpi sgt, %21, %22 : vector<2x1xi32>
    %24 = arith.extui %23 : vector<2x1xi1> to vector<2x1xi32>
    %25 = arith.sitofp %24 : vector<2x1xi32> to vector<2x1xf32>
    %26 = vector.broadcast %25 : vector<2x1xf32> to vector<2x8xf32>
    %27 = arith.mulf %17, %26 : vector<2x8xf32>
    %28 = arith.addf %10, %27 : vector<2x8xf32>
    %cst_12 = arith.constant dense<0xFF800000> : vector<2xf32>
    %29 = vector.multi_reduction <maximumf>, %28, %cst_12 [1] : vector<2x8xf32> to vector<2xf32>
    %30 = vector.shape_cast %29 : vector<2xf32> to vector<2x1xf32>
    %31 = vector.broadcast %30 : vector<2x1xf32> to vector<2x8xf32>
    %32 = arith.subf %28, %31 : vector<2x8xf32>
    %33 = math.exp %32 : vector<2x8xf32>
    %cst_13 = arith.constant dense<0.000000e+00> : vector<2xf32>
    %34 = vector.multi_reduction <add>, %33, %cst_13 [1] : vector<2x8xf32> to vector<2xf32>
    %35 = vector.shape_cast %34 : vector<2xf32> to vector<2x1xf32>
    %36 = tpu.reciprocal %35 : vector<2x1xf32> -> vector<2x1xf32>
    %37 = vector.broadcast %36 : vector<2x1xf32> to vector<2x8xf32>
    %38 = arith.mulf %33, %37 : vector<2x8xf32>
    %39 = vector.shape_cast %38 : vector<2x8xf32> to vector<2x8x1xf32>
    %40 = vector.broadcast %39 : vector<2x8x1xf32> to vector<2x8x32xf32>
    %41 = arith.mulf %40, %0 : vector<2x8x32xf32>
    %cst_14 = arith.constant dense<0.000000e+00> : vector<2x32xf32>
    %42 = vector.multi_reduction <add>, %41, %cst_14 [1] : vector<2x8x32xf32> to vector<2x32xf32>
    %c0_15 = arith.constant 0 : index
    %c0_16 = arith.constant 0 : index
    %43 = vector.load %arg5[%c0_15, %c0_16] : memref<2x64xf32, #tpu.memory_space<vmem>>, vector<2x64xf32>
    %c0_17 = arith.constant 0 : index
    %c0_18 = arith.constant 0 : index
    %44 = vector.load %arg6[%c0_17, %c0_18] : memref<32x64xf32, #tpu.memory_space<vmem>>, vector<32x64xf32>
    %cst_19 = arith.constant dense<0.000000e+00> : vector<2x32xf32>
    %45 = tpu.matmul %43, %44, %cst_19 {dimension_numbers = #tpu.dot_dimension_numbers<[1], [1], [0], [0], [0, 0, 1, 0], [], []>} : vector<2x64xf32>, vector<32x64xf32>, vector<2x32xf32> -> vector<2x32xf32>
    %c0_20 = arith.constant 0 : index
    %c0_21 = arith.constant 0 : index
    %46 = vector.load %arg7[%c0_20, %c0_21] : memref<1x32xf32, #tpu.memory_space<vmem>>, vector<1x32xf32>
    %47 = vector.broadcast %46 : vector<1x32xf32> to vector<2x32xf32>
    %48 = arith.addf %45, %47 : vector<2x32xf32>
    %cst_22 = arith.constant 8.000000e-01 : f32
    %49 = vector.broadcast %cst_22 : f32 to vector<2x32xf32>
    %50 = arith.mulf %49, %42 : vector<2x32xf32>
    %cst_23 = arith.constant 2.000000e-01 : f32
    %51 = vector.broadcast %cst_23 : f32 to vector<2x32xf32>
    %52 = arith.mulf %51, %48 : vector<2x32xf32>
    %53 = arith.addf %50, %52 : vector<2x32xf32>
    %c0_24 = arith.constant 0 : index
    %c0_25 = arith.constant 0 : index
    %54 = vector.load %arg8[%c0_24, %c0_25] : memref<32x128xbf16, #tpu.memory_space<vmem>>, vector<32x128xbf16>
    %55 = arith.truncf %53 : vector<2x32xf32> to vector<2x32xbf16>
    %cst_26 = arith.constant dense<0.000000e+00> : vector<2x128xf32>
    %56 = tpu.matmul %55, %54, %cst_26 {dimension_numbers = #tpu.dot_dimension_numbers<[1], [0], [0], [1], [0, 0, 1, 1], [], []>} : vector<2x32xbf16>, vector<32x128xbf16>, vector<2x128xf32> -> vector<2x128xf32>
    %c0_27 = arith.constant 0 : index
    %c0_28 = arith.constant 0 : index
    %57 = vector.load %arg9[%c0_27, %c0_28] : memref<1x128xf32, #tpu.memory_space<vmem>>, vector<1x128xf32>
    %58 = vector.broadcast %57 : vector<1x128xf32> to vector<2x128xf32>
    %59 = arith.addf %56, %58 : vector<2x128xf32>
    %c0_29 = arith.constant 0 : index
    %c0_30 = arith.constant 0 : index
    %60 = vector.load %arg10[%c0_29, %c0_30] : memref<2x128xf32, #tpu.memory_space<vmem>>, vector<2x128xf32>
    tpu.vector_store %arg10[%c0_29, %c0_30], %59 {strides = array<i32>} : memref<2x128xf32, #tpu.memory_space<vmem>>, vector<2x128xf32>,
    return
  }
  func.func @transform_0(%arg0: i32) -> (i32, i32) {
    %c0_i32 = arith.constant 0 : i32
    %c0_i32_0 = arith.constant 0 : i32
    %c0_i32_1 = arith.constant 0 : i32
    return %c0_i32, %c0_i32_0 : i32, i32
  }
  func.func @transform_1(%arg0: i32) -> (i32, i32, i32) {
    %c0_i32 = arith.constant 0 : i32
    %c0_i32_0 = arith.constant 0 : i32
    %c0_i32_1 = arith.constant 0 : i32
    %c0_i32_2 = arith.constant 0 : i32
    return %c0_i32, %c0_i32_0, %c0_i32_1 : i32, i32, i32
  }
  func.func @transform_2(%arg0: i32) -> (i32, i32) {
    %c0_i32 = arith.constant 0 : i32
    %c0_i32_0 = arith.constant 0 : i32
    %c0_i32_1 = arith.constant 0 : i32
    return %c0_i32, %c0_i32_0 : i32, i32
  }
  func.func @transform_3(%arg0: i32) -> (i32, i32) {
    %c0_i32 = arith.constant 0 : i32
    %c0_i32_0 = arith.constant 0 : i32
    %c0_i32_1 = arith.constant 0 : i32
    return %c0_i32, %c0_i32_0 : i32, i32
  }
  func.func @transform_4(%arg0: i32) -> (i32, i32) {
    %c0_i32 = arith.constant 0 : i32
    %c0_i32_0 = arith.constant 0 : i32
    %c0_i32_1 = arith.constant 0 : i32
    return %c0_i32, %c0_i32_0 : i32, i32
  }
  func.func @transform_5(%arg0: i32) -> (i32, i32) {
    %c0_i32 = arith.constant 0 : i32
    %c0_i32_0 = arith.constant 0 : i32
    %c0_i32_1 = arith.constant 0 : i32
    return %c0_i32, %c0_i32_0 : i32, i32
  }
  func.func @transform_6(%arg0: i32) -> (i32, i32) {
    %c0_i32 = arith.constant 0 : i32
    %c0_i32_0 = arith.constant 0 : i32
    %c0_i32_1 = arith.constant 0 : i32
    return %c0_i32, %c0_i32_0 : i32, i32
  }
  func.func @transform_7(%arg0: i32) -> (i32, i32) {
    %c0_i32 = arith.constant 0 : i32
    %c0_i32_0 = arith.constant 0 : i32
    return %c0_i32, %arg0 : i32, i32
  }
  func.func @transform_8(%arg0: i32) -> (i32, i32) {
    %c0_i32 = arith.constant 0 : i32
    %c0_i32_0 = arith.constant 0 : i32
    return %c0_i32, %arg0 : i32, i32
  }
  func.func @transform_9(%arg0: i32) -> (i32, i32) {
    %c0_i32 = arith.constant 0 : i32
    %c0_i32_0 = arith.constant 0 : i32
    return %c0_i32, %arg0 : i32, i32
  }
}

</mosaic_0001>

<bundles_post_ra>
// kernel: forward.1
= control target key start
LH: loop header
LB: loop body
LE: loop exit
PB: predicated region body
PF: predicated region fallthrough
CT: control target
= control target key end

     0   :  { %s1519_s0 = inlined_call_operand.vmem [shape: s32[2,8], index: 0, kind: input, shape index: {}]   ;;  %s1520_s1 = inlined_call_operand.hbm [shape: f32[2,8,32], index: 1, kind: input, shape index: {}]   ;;  %s1521_s2 = inlined_call_operand.hbm [shape: f32[32,32], index: 2, kind: input, shape index: {}]   ;;  %s1522_s3 = inlined_call_operand.hbm [shape: f32[1,32], index: 3, kind: input, shape index: {}]   ;;  %s1523_s4 = inlined_call_operand.vmem [shape: f32[2,64], index: 4, kind: input, shape index: {}]   ;;  %s1524_s5 = inlined_call_operand.hbm [shape: f32[32,64], index: 5, kind: input, shape index: {}]   ;;  %s1525_s6 = inlined_call_operand.vmem [shape: f32[1,32], index: 6, kind: input, shape index: {}]   ;;  %s1526_s7 = inlined_call_operand.hbm [shape: bf16[32,512], index: 7, kind: input, shape index: {}]   ;;  %s1527_s8 = inlined_call_operand.vmem [shape: f32[1,512], index: 8, kind: input, shape index: {}]   ;;  %s1528_s9 = inlined_call_operand.hbm [shape: f32[2,512], index: 9, kind: output, shape index: {}]  }
   0x1   :  { %1535 = sst [smem:[#allocation22_spill]] %s1520_s1 }
   0x2   :  { %1536 = sst [smem:[#allocation23_spill]] %s1521_s2 }
   0x3   :  { %1537 = sst [smem:[#allocation24_spill]] %s1522_s3 }
   0x4   :  { %1538 = sst [smem:[#allocation25_spill]] %s1524_s5 }
   0x5   :  { %14 = vsyncpa [#allocation3], 0 }
   0x6   :  { %15 = vsyncpa [#allocation6], 0 }
   0x7   :  { %16 = vsyncpa [#allocation9], 0 }
   0x8   :  { %17 = vsyncpa [#allocation4], 0 }
   0x9   :  { %19 = vsyncpa [#allocation4 + $0x1], 0  ;;  %s1295_s30 = smov 0   ;;  %s1297_s10 = smov 0  }
   0xa   :  { %s1299_s11 = smov 0   ;;  %s1301_s12 = smov 0  }
   0xb LB: > { %1539 = sst [smem:[#allocation17_spill]] %s1219_s30  ;;  %s1316_s13 = sadd.s32 4294967295, %s1231_s12   ;;  %s1231_s12 = sphi %s1301_s12, %s1558_s12   ;;  %s1227_s11 = sphi %s1299_s11, %s1562_s11   ;;  %s1223_s10 = sphi %s1297_s10, %s1561_s10   ;;  %s1219_s30 = sphi %s1295_s30, %s1560_s30  }
   0xc   : > { %s847_s14 = sadd.s32 4294967294, %s1231_s12   ;;  %s1320_s15 = sadd.s32 1, %s1231_s12  }
   0xd   : > { %1540 = sst [smem:[#allocation18_spill]] %s1320_s15  ;;  %s179_s16 = sadd.s32 1, %s1227_s11 }
   0xe   : > { %s176_s17 = ssub.s32 %s1231_s12, %s1320_s15  ;;  %p186_p0 = scmp.ne.s32.totalorder %s1227_s11, %s1223_s10 }
   0xf   : > { %p177_p1 = scmp.eq.s32.totalorder %s176_s17, 0  ;;  %p187_p2 = scmp.eq.s32.totalorder %s1231_s12, 0 }
  0x10   : > { %p192_p3 = scmp.ne.s32.totalorder %s1223_s10, %s1219_s30  ;;  %p193_p4 = scmp.eq.s32.totalorder %s1316_s13, 0 }
  0x11   : > { %s1332_s18 = scalar_select %p177_p1, %s1227_s11, %s179_s16  }
  0x12   : > { %p1334_p5 = por %p187_p2, %p186_p0  ;;  %p1340_p6 = por %p193_p4, %p192_p3 }
  0x13   : > { %1541 = sst [smem:[#allocation19_spill]] %s1332_s18  ;;  %p242_p7 = scmp.eq.s32.totalorder %s1316_s13, 3 }
  0x14   : > { %p248_p8 = scmp.eq.s32.totalorder %s847_s14, 3  ;;  %p848_p9 = scmp.ge.s32.totalorder %s1231_s12, 1 }
  0x15   : > { %p255_p10 = scmp.lt.s32.totalorder %s1231_s12, 5  ;;  %p1347_p11 = por %p242_p7, %p186_p0 }
  0x16   : > { %p1351_p12 = por %p248_p8, %p192_p3  ;;  %s1549_s1 = sld [smem:[#allocation22_spill]] }
  0x17   : > { %s1544_s21 = scalar_select %p1347_p11, 1, 0 }
  0x18   : > { %s1546_s22 = scalar_select %p1351_p12, 1, 0 }
  0x19   : > { %1545 = sst [smem:[#allocation20_spill]] %s1544_s21  ;;  %p1355_p13 = pnand %p848_p9, %p255_p10 }
  0x1a   : > { %1547 = sst [smem:[#allocation21_spill]] %s1546_s22  ;;  %s1233_s27 = smov [#allocation2]  }
  0x1b   : > { %p911_p1 = pneg %p1355_p13  ;;  %s271_s28 = sshll.u32 %s1233_s27, 4  ;;  %s272_s28 = int_to_ptr.vmem [resolvable:$true] %s271_s28 }
  0x1c   : > { %s269_s26 = sshll.u32 %s1549_s1, 4  ;;  %p936_p2 = scmp.lt.s32.totalorder %s1231_s12, 4  ;;  %s270_s26 = int_to_ptr.hbm [resolvable:$true] %s269_s26 }
  0x1d   : > { %p1366_p0 = pnand %p911_p1, %p193_p4  ;;  %s1234_s14 = smov 128  }
  0x1e   : > { %s1235_s16 = smov 8   ;;  %p1375_p3 = pnand %p936_p2, %p1334_p5 }
  0x1f   : > { %914 = dma.hbm_to_vmem [thread:$0]  (!%p1366_p0), %s270_s26, 256, %s272_s28, [#allocation3], %s1234_s14, %s1234_s14, %s1235_s16  }
  0x20   : > { %s1552_s2 = sld [smem:[#allocation23_spill]]  ;;  %s1236_s1 = smov [#allocation5]  }
  0x21   : > { %s285_s18 = sshll.u32 %s1236_s1, 4  ;;  %s1553_s3 = sld [smem:[#allocation24_spill]]  ;;  %s286_s18 = int_to_ptr.vmem [resolvable:$true] %s285_s18 }
  0x22   : > { %s1237_s19 = smov [#allocation7]   ;;  %s1554_s5 = sld [smem:[#allocation25_spill]] }
  0x23   : > { %s300_s28 = sshll.u32 %s1237_s19, 4  ;;  %s331_s1 = sand.u32 1, %s1231_s12   ;;  %s301_s28 = int_to_ptr.vmem [resolvable:$true] %s300_s28 }
  0x24   : > { %s1238_s25 = smov [#allocation8]   ;;  %s333_s15 = sand.u32 1, %s1227_s11  }
  0x25   : > { %s855_s22 = sshll.u32 %s1231_s12, 2  ;;  %p1127_p7 = pneg %p1375_p3 }
  0x26   : > { %s283_s27 = sshll.u32 %s1552_s2, 4  ;;  %s314_s2 = sshll.u32 %s1238_s25, 4  ;;  %s284_s27 = int_to_ptr.hbm [resolvable:$true] %s283_s27  ;;  %s315_s2 = int_to_ptr.vmem [resolvable:$true] %s314_s2 }
  0x27   : > { %s298_s26 = sshll.u32 %s1553_s3, 4  ;;  %s339_s3 = scalar_lea.hbm %s1526_s7, %s855_s22  ;;  %s299_s26 = int_to_ptr.hbm [resolvable:$true] %s298_s26 }
  0x28   : > { %917 = dma.hbm_to_vmem [thread:$0]  (!%p1366_p0), %s284_s27, 512, %s286_s18, [#allocation6], %s1234_s14, %s1234_s14, %s1235_s16  }
  0x29   : > { %s312_s24 = sshll.u32 %s1554_s5, 4  ;;  %s854_s18 = sshll.u32 %s333_s15, 4  ;;  %s313_s24 = int_to_ptr.hbm [resolvable:$true] %s312_s24 }
  0x2a   : > { %920 = dma.hbm_to_vmem [thread:$0]  (!%p1366_p0), %s299_s26, 16, %s301_s28, [#allocation6]  }
  0x2b   : > { %923 = dma.hbm_to_vmem [thread:$0]  (!%p1366_p0), %s313_s24, 512, %s315_s2, [#allocation9], %s1234_s14, %s1234_s14, %s1235_s16  }
  0x2c   : > { %s340_s30 = sshll.u32 %s339_s3, 4  ;;  %s335_s21 = scalar_lea.vmem [#allocation10], %s854_s18  ;;  %s341_s30 = int_to_ptr.hbm [resolvable:$true] %s340_s30 }
  0x2d   : > { %s342_s5 = sshll.u32 %s335_s21, 4  ;;  %s332_s26 = scalar_lea.sflag [#allocation3], %s331_s1  ;;  %s343_s5 = int_to_ptr.vmem [resolvable:$true] %s342_s5 }
  0x2e   : > { %s1123_s28 = sshra.s32 %s341_s30, 4  ;;  %s1130_s14 = scalar_lea.hbm %s1526_s7, 64  ;;  %s1124_s28 = int_to_ptr.hbm [resolvable:$true] %s1123_s28 }
  0x2f   : > { %s1125_s25 = scalar_lea.hbm %s1124_s28, 16  ;;  %p1131_p10 = scmp.lt.s32.totalorder %s1124_s28, %s1526_s7 }
  0x30   : > { %p1126_p5 = scmp.ne.s32.totalorder %s1124_s28, %s1125_s25  ;;  %p1132_p1 = scmp.lt.s32.totalorder %s1130_s14, %s1125_s25 }
  0x32   : > { %p1128_p8 = pnand %p1127_p7, %p1126_p5  ;;  %p1133_p0 = por %p1132_p1, %p1131_p10 }
  0x34   : > { %p1129_p9 = pneg %p1128_p8 }
  0x36   : > { %p1134_p2 = pnand %p1133_p0, %p1129_p9 }
  0x38   : > { %1137 = shalt.err (!%p1134_p2)
}
  0x39   : > { %s1239_s3 = smov 256   ;;  %s1240_s1 = smov 64  }
  0x3a   : > { %s1241_s15 = smov 4   ;;  %360 = sbr.rel (%p1355_p13) target bundleno = 1138 (0x472), region = 56 }
  0x3b   : > { %927 = dma.hbm_to_vmem [thread:$0]  (!%p1375_p3), %s341_s30, 256, %s343_s5, %s332_s26, %s1239_s3, %s1240_s1, %s1241_s15  }
  0x3f   : > { %1198 = dma.done.wait (%p193_p4), [#allocation3], 256  }
  0x40   : > { %1200 = vsyncadd (%p193_p4), [#allocation3], 4294967040 }
  0x41   : > { %1202 = dma.done.wait (%p193_p4), [#allocation6], 528  }
  0x42   : > { %1204 = vsyncadd (%p193_p4), [#allocation6], 4294966768 }
  0x43   : > { %1206 = dma.done.wait (%p193_p4), [#allocation9], 512  }
  0x44   : > { %1208 = vsyncadd (%p193_p4), [#allocation9], 4294966784  ;;  %s382_s5 = sand.u32 1, %s1316_s13   ;;  %s1426_s23 = sand.u32 1, %s1223_s10  }
  0x45   : > { %s861_s17 = sshll.u32 %s1426_s23, 4  ;;  %s383_s18 = scalar_lea.sflag [#allocation3], %s382_s5 }
  0x46   : > { %s1429_s22 = scalar_lea.vmem [#allocation10], %s861_s17 }
  0x47   : > { %1210 = dma.done.wait (%p1340_p6), %s383_s18, 256  }
  0x48   : > { %1212 = vsyncadd (%p1340_p6), %s383_s18, 4294967040  ;;  %v1242_v0 = vmov 0   ;;  %v434_v1 = vld [vmem:[#allocation5 + $0x18] sm:$0xff]  ;;  %v433_v2 = vld [vmem:[#allocation5 + $0x10] sm:$0xff]  ;;  %vm486_vm1 = vcmask 58368   ;;  %vm1243_vm2 = vmmov 1   ;;  %v506_v14 = vlaneseq }
  0x49   : > { %987 = vset.pattern.permute.xlu0 %v1242_v0  ;;  %988 = vset.pattern.permute.xlu1 %v1242_v0  ;;  %v432_v3 = vld [vmem:[#allocation5 + $0x8] sm:$0xff]  ;;  %v479_v4 = vld [vmem:[%s1519_s0] sm:$0x3]  ;;  %v431_v5 = vld [vmem:[#allocation5] sm:$0xff]  ;;  %vm435_vm4 = vcmask 261120   ;;  %v1244_v21 = vmov 0.0  }
  0x4a   : > { %454 = vmatpush.msra.mxu0 %v434_v1  ;;  %887 = vmatpush.msra.mxu3 %v434_v1  ;;  %vm480_vm0 = vcmp.eq.s32.totalorder %v479_v4, 31161  ;;  %v1441_v6 = vld [vmem:[#allocation2] sm:$0xff]  ;;  %v1443_v7 = vld [vmem:[#allocation2 + $0x8] sm:$0xff]  ;;  %v507_v15 = vshrl.u32 %v506_v14, 7  ;;  %v990_v25 = vld [vmem:[#allocation7] ss:$0 sm:$0xff] }
  0x4b   : > { %vm484_vm3 = vmxor %vm480_vm0, %vm1243_vm2  ;;  %v865_v22 = vsel %vm480_vm0, 1.0, %v1244_v21  ;;  %v532_v44 = vand.u32 127, %v506_v14  ;;  %vm535_vm6 = vcmask 1041409   ;;  %v618_v60 = vld [vmem:[#allocation8 + $0x18] sm:$0xff]  ;;  %vm623_vm7 = vcmask 523264   ;;  %v617_v61 = vld [vmem:[#allocation8 + $0x10] sm:$0xff] }
  0x4c   : > { %455 = vmatpush.msra.mxu0 %v433_v2  ;;  %888 = vmatpush.msra.mxu3 %v433_v2  ;;  %v485_v8 = vsel %vm484_vm3, 1, %v1242_v0  ;;  %v483_v26 = vmul.f32 -1e+30, %v865_v22  ;;  %v616_v62 = vld [vmem:[#allocation8 + $0x8] sm:$0xff]  ;;  %v615_v63 = vld [vmem:[#allocation8] sm:$0xff]  ;;  %p425_p4 = scmp.lt.s32.totalorder %s1316_s13, 3 }
  0x4d   : > { %v487_v9 = vsel %vm486_vm1, %v485_v8, 0  ;;  %986 = vset.pattern.permute.xlu2 %v507_v15  ;;  %867 = vmatpush.xpose.msk.msra.mxu1 %vm623_vm7, %v618_v60  ;;  %s882_s14 = sshll.u32 %s1316_s13, 1  ;;  %s862_s16 = sshll.u32 %s1426_s23, 1 }
  0x4e   : > { %456 = vmatpush.msra.mxu0 %v432_v3  ;;  %889 = vmatpush.msra.mxu3 %v432_v3  ;;  %v489_v10 = vshrl.u32 %v487_v9, 16  ;;  %v488_v12 = vand.u32 65535, %v487_v9  ;;  %s1464_s21 = scalar_select %p425_p4, %s1316_s13, 3 }
  0x4f   : > { %s725_s15 = scalar_lea.hbm %s1528_s9, %s882_s14  ;;  %s424_s18 = scalar_lea.vmem [#allocation11], %s862_s16 }
  0x50   : > { %457 = vmatpush.msra.mxu0 %v431_v5  ;;  %890 = vmatpush.msra.mxu3 %v431_v5  ;;  %v491_v11 = vcvt.s32.f32 %v489_v10  ;;  %v490_v13 = vcvt.s32.f32 %v488_v12  ;;  %s427_s25 = scalar_lea.vmem %s1527_s8, %s1464_s21  ;;  %s729_s27 = sshll.u32 %s725_s15, 4  ;;  %s730_s27 = int_to_ptr.hbm [resolvable:$true] %s729_s27 }
  0x51   : > { %863 = vmatmul.msk.f32.vlgmr.msra.gmra.mxu0 %vm435_vm4, %v1441_v6  ;;  %864 = vmatmul.msk.f32.vlgmr.msra.gmra.mxu3 %vm435_vm4, %v1443_v7  ;;  %s715_s13 = scalar_lea.sflag [#allocation4], %s1426_s23  ;;  %s1167_s19 = sshra.s32 %s730_s27, 4  ;;  %s1168_s19 = int_to_ptr.hbm [resolvable:$true] %s1167_s19 }
  0x52   : > { %494 = vadd.xlane.f32.xlu0 %v491_v11  ;;  %868 = vmatpush.xpose.msk.msra.mxu1 %vm623_vm7, %v617_v61  ;;  %s1169_s20 = scalar_lea.hbm %s1168_s19, 2  ;;  %s1173_s21 = scalar_lea.hbm %s1528_s9, 8 }
  0x53   : > { %p1170_p6 = scmp.ne.s32.totalorder %s1168_s19, %s1169_s20  ;;  %p1174_p5 = scmp.lt.s32.totalorder %s1168_s19, %s1528_s9 }
  0x54   : > { %p1175_p7 = scmp.lt.s32.totalorder %s1173_s21, %s1169_s20 }
  0x55   : > { %p1171_p13 = pnand %p1170_p6, %p1347_p11 }
  0x56   : > { %869 = vmatpush.xpose.msk.msra.mxu1 %vm623_vm7, %v616_v62  ;;  %p1176_p8 = por %p1175_p7, %p1174_p5 }
  0x57   : > { %p1172_p3 = pneg %p1171_p13 }
  0x59   : > { %p1177_p9 = pnand %p1176_p8, %p1172_p3 }
  0x5a   : > { %492 = vadd.xlane.f32.xlu0 %v490_v13  ;;  %870 = vmatpush.xpose.msk.msra.mxu1 %vm623_vm7, %v615_v63 }
  0xc5   : > { %v495_v16 = vpop.xlane.xlu0 %494 }
  0xc6   : > { %v497_v17 = vcvt.f32.s32 %v495_v16 }
  0xc8   : > { %v498_v19 = vshll.u32 %v497_v17, 16 }
  0xcd   : > { %v493_v20 = vpop.xlane.xlu0 %492 }
  0xce   : > { %v459_v18 = vpop.f32.mrf.mxu0  ;;  %v496_v23 = vcvt.f32.s32 %v493_v20 }
  0xcf   : > { %993 = vtanh.f32 %v459_v18 }
  0xd0   : > { %v499_v24 = vadd.s32 %v498_v19, %v496_v23 }
  0xd2   : > { %vm500_vm5 = vcmp.gt.s32.totalorder %v499_v24, 0 }
  0xd3   : > { %v866_v29 = vsel %vm500_vm5, 1.0, %v1244_v21 }
  0xd4   : > { %v462_v27 = vpop.f32.mrf.mxu3  ;;  %v503_v31 = vmul.f32 %v866_v29, %v483_v26  ;;  %v885_v29 = vld [vmem:[%s1429_s22] sm:$0xff] }
  0xd5   : > { %v994_v28 = vpop.eup %993  ;;  %995 = vtanh.f32 %v462_v27  ;;  %v886_v27 = vld [vmem:[%s1429_s22 + $0x8] sm:$0xff]  ;;  %s727_s22 = sshll.u32 %s424_s18, 4  ;;  %s728_s22 = int_to_ptr.vmem [resolvable:$true] %s727_s22 }
  0xd6   : > { %v471_v30 = vmul.f32 %v994_v28, %v990_v25  ;;  %v505_v33 = vperm.slane %v503_v31, 0  ;;  %v512_v37 = vperm.slane %v503_v31, 1  ;;  %706 = vmatpush.bf16.msra.mxu2 %v886_v27 }
  0xd8   : > { %v473_v32 = vsel %vm435_vm4, %v471_v30, 0.0  ;;  %510 = vperm.xlu2 %986, %v505_v33  }
  0xd9   : > { %474 = vadd.xlane.f32.xlu1 %v473_v32 }
  0xda   : > { %707 = vmatpush.bf16.msra.mxu2 %v885_v29 }
  0xdb   : > { %v996_v34 = vpop.eup %995 }
  0xdc   : > { %v472_v35 = vmul.f32 %v996_v34, %v990_v25 }
  0xde   : > { %v476_v36 = vsel %vm435_vm4, %v472_v35, 0.0 }
  0xe0   : > { %517 = vperm.xlu2 %986, %v512_v37  }
  0xe1   : > { %477 = vadd.xlane.f32.xlu1 %v476_v36 }
  0xe8   : > { %989 = vset.pattern.permute.xlu2 %v1242_v0  ;;  %v614_v0 = vld [vmem:[%s1523_s4] sm:$0x3] }
  0xe9   : > { %871 = vmatmul.msk.f32.vlgmr.msra.gmra.mxu1 %vm623_vm7, %v614_v0 }
 0x132   : > { %v511_v38 = vpop.permute.xlu2 %510 }
 0x13a   : > { %v518_v41 = vpop.permute.xlu2 %517 }
 0x14c   : > { %v475_v39 = vpop.xlane.xlu1 %474 }
 0x14d   : > { %v521_v40 = vadd.f32 %v511_v38, %v475_v39 }
 0x14f   : > { %526 = vperm.xlu0 %987, %v521_v40  }
 0x154   : > { %v478_v42 = vpop.xlane.xlu1 %477 }
 0x155   : > { %v522_v43 = vadd.f32 %v518_v41, %v478_v42 }
 0x157   : > { %529 = vperm.xlu1 %988, %v522_v43  }
 0x166   : > { %v656_v38 = vpop.f32.mrf.mxu1 }
 0x1c1   : > { %v527_v45 = vpop.permute.xlu0 %526 }
 0x1c2   : > { %v533_v47 = vperm.slane %v527_v45, %v532_v44 }
 0x1c9   : > { %v530_v46 = vpop.permute.xlu1 %529 }
 0x1ca   : > { %v534_v48 = vperm.slane %v530_v46, %v532_v44 }
 0x1cc   : > { %v536_v49 = vsel %vm535_vm6, %v534_v48, %v533_v47 }
 0x1cd   : > { %v538_v50 = vsel %vm486_vm1, %v536_v49, -inf }
 0x1ce   : > { %539 = vmax.xlane.f32.xlu2 %v538_v50 }
 0x241   : > { %v540_v51 = vpop.xlane.xlu2 %539 }
 0x242   : > { %v542_v52 = vperm.slane %v540_v51, 0  ;;  %v543_v53 = vperm.slane %v540_v51, 1 }
 0x244   : > { %v546_v54 = vsub.f32 %v521_v40, %v542_v52  ;;  %v547_v56 = vsub.f32 %v522_v43, %v543_v53 }
 0x246   : > { %v548_v55 = vmul.f32 1.442695, %v546_v54  ;;  %v550_v57 = vmul.f32 1.442695, %v547_v56 }
 0x248   : > { %997 = vpow2.f32 %v548_v55 }
 0x249   : > { %999 = vpow2.f32 %v550_v57 }
 0x24e   : > { %v998_v58 = vpop.eup %997 }
 0x24f   : > { %555 = vperm.xlu1 %988, %v998_v58   ;;  %v1000_v59 = vpop.eup %999 }
 0x257   : > { %558 = vperm.xlu1 %988, %v1000_v59  }
 0x2c1   : > { %v556_v1 = vpop.permute.xlu1 %555 }
 0x2c2   : > { %v560_v3 = vperm.slane %v556_v1, %v532_v44 }
 0x2c9   : > { %v559_v2 = vpop.permute.xlu1 %558 }
 0x2ca   : > { %v561_v4 = vperm.slane %v559_v2, %v532_v44 }
 0x2cc   : > { %v562_v5 = vsel %vm535_vm6, %v561_v4, %v560_v3 }
 0x2cd   : > { %v564_v8 = vsel %vm486_vm1, %v562_v5, 0.0 }
 0x2ce   : > { %565 = vadd.xlane.f32.xlu0 %v564_v8 }
 0x341   : > { %v566_v9 = vpop.xlane.xlu0 %565 }
 0x342   : > { %1001 = vrcp.f32 %v566_v9  ;;  %v578_v13 = vand.u32 2147483648, %v566_v9  ;;  %v576_v15 = vand.u32 2147483647, %v566_v9  ;;  %vm572_vm9 = vweird.f32 %v566_v9 }
 0x344   : > { %v579_v17 = vor.u32 1.1754944e-38, %v578_v13  ;;  %vm577_vm11 = vcmp.eq.f32.partialorder %v576_v15, 8.507059e+37 }
 0x348   : > { %v1002_v10 = vpop.eup %1001 }
 0x349   : > { %v568_v11 = vmul.f32 %v1002_v10, %v566_v9  ;;  %vm573_vm8 = vweird.f32 %v1002_v10 }
 0x34a   : > { %vm574_vm10 = vmor %vm572_vm9, %vm573_vm8 }
 0x34b   : > { %v569_v12 = vsub.f32 1.0, %v568_v11 }
 0x34d   : > { %v570_v14 = vmul.f32 %v1002_v10, %v569_v12 }
 0x34f   : > { %v571_v16 = vadd.f32 %v1002_v10, %v570_v14 }
 0x351   : > { %v575_v18 = vsel %vm574_vm10, %v1002_v10, %v571_v16 }
 0x352   : > { %v580_v19 = vsel %vm577_vm11, %v579_v17, %v575_v18 }
 0x353   : > { %v583_v20 = vperm.slane %v580_v19, 1  ;;  %v582_v21 = vperm.slane %v580_v19, 0 }
 0x355   : > { %v587_v22 = vmul.f32 %v1000_v59, %v583_v20  ;;  %v586_v23 = vmul.f32 %v998_v58, %v582_v21  ;;  %v992_v58 = vld [vmem:[%s427_s25] ss:$0 sm:$0xff] }
 0x357   : > { %595 = vperm.xlu1 %988, %v587_v22   ;;  %590 = vperm.xlu2 %989, %v586_v23  }
 0x3b1   : > { %v591_v24 = vpop.permute.xlu2 %590 }
 0x3b2   : > { %v598_v25 = vmul.f32 %v591_v24, %v1441_v6  ;;  %v991_v6 = vld [vmem:[%s1525_s6] ss:$0 sm:$0xff] }
 0x3b3   : > { %v657_v41 = vadd.f32 %v991_v6, %v656_v38 }
 0x3b4   : > { %v600_v26 = vsel %vm435_vm4, %v598_v25, 0.0 }
 0x3b5   : > { %v601_v28 = vrot.slane %v600_v26, 4  ;;  %v661_v45 = vmul.f32 0.2, %v657_v41 }
 0x3b7   : > { %v602_v30 = vadd.f32 %v601_v28, %v600_v26 }
 0x3b9   : > { %v603_v31 = vrot.slane %v602_v30, 2 }
 0x3bb   : > { %v604_v32 = vadd.f32 %v603_v31, %v602_v30 }
 0x3bd   : > { %v605_v36 = vrot.slane %v604_v32, 1 }
 0x3bf   : > { %v606_v40 = vadd.f32 %v605_v36, %v604_v32 }
 0x3c1   : > { %v659_v44 = vmul.f32 0.8, %v606_v40 }
 0x3c3   : > { %v666_v48 = vadd.f32 %v661_v45, %v659_v44 }
 0x3c5   : > { %v672_v51 = vpack.c.bf16 %v666_v48, %v666_v48 }
 0x3c7   : > { %v680_v54 = vunpack.c.l.b16 %v672_v51 }
 0x3c9   : > { %v596_v33 = vpop.permute.xlu1 %595 }
 0x3ca   : > { %v599_v34 = vmul.f32 %v596_v33, %v1443_v7  ;;  %v663_v7 = vrot.slane %v661_v45, 1 }
 0x3cc   : > { %v607_v35 = vsel %vm435_vm4, %v599_v34, 0.0 }
 0x3cd   : > { %v608_v37 = vrot.slane %v607_v35, 4 }
 0x3cf   : > { %v609_v39 = vadd.f32 %v608_v37, %v607_v35 }
 0x3d1   : > { %v610_v42 = vrot.slane %v609_v39, 2 }
 0x3d3   : > { %v611_v43 = vadd.f32 %v610_v42, %v609_v39 }
 0x3d5   : > { %v612_v46 = vrot.slane %v611_v43, 1 }
 0x3d7   : > { %v613_v47 = vadd.f32 %v612_v46, %v611_v43 }
 0x3d9   : > { %v660_v49 = vmul.f32 0.8, %v613_v47 }
 0x3db   : > { %v667_v50 = vadd.f32 %v663_v7, %v660_v49 }
 0x3dd   : > { %v673_v52 = vpack.c.bf16 %v667_v50, %v667_v50 }
 0x3df   : > { %v681_v53 = vunpack.c.l.b16 %v673_v52 }
 0x3e1   : > { %v682_v55 = vrot.slane %v681_v53, 7 }
 0x3e3   : > { %v683_v56 = vsel %vm535_vm6, %v682_v55, %v680_v54 }
 0x3e4   : > { %v684_v57 = vpack.c.b16 %v683_v56, %v683_v56 }
 0x3e6   : > { %880 = vmatmul.msk.bf16.vlgmr.msra.gmra.mxu2 %vm435_vm4, %v684_v57 }
 0x469   : > { %v709_v59 = vpop.f32.mrf.mxu2 }
 0x46a   : > { %v710_v60 = vadd.f32 %v992_v58, %v709_v59 }
 0x46c   : > { %713 = vst [vmem:[%s424_s18] sm:$0x3] %v710_v60 }
 0x46d   : > { %1180 = shalt.err (!%p1177_p9)
}
 0x46e   : > { %909 = dma.vmem_to_hbm [thread:$0]  (%p1347_p11), %s728_s22, 32, %s730_s27, %s715_s13  }
 0x471   : > { %v711_v61 = vpop.f32.mrf.mxu2 }
 0x472 PF: > { %s1556_s23 = sld [smem:[#allocation17_spill]]  ;;  %p941_p10 = scmp.ge.s32.totalorder %s1231_s12, 2 }
 0x474   : > { %p929_p1 = pnand %p941_p10, %p1351_p12 }
 0x476   : > { %p930_p0 = pneg %p929_p1 }
 0x478   : > { %s741_s29 = sand.u32 1, %s1556_s23  }
 0x479   : > { %s742_s14 = scalar_lea.sflag [#allocation4], %s741_s29 }
 0x47a   : > { %1214 = dma.done.wait (%p930_p0), %s742_s14, 32  }
 0x47b   : > { %1216 = vsyncadd (%p930_p0), %s742_s14, 4294967264  ;;  %s1558_s12 = sld [smem:[#allocation18_spill]]  ;;  %s1560_s30 = smov %s1223_s10 }
 0x47c   : > { %s1559_s16 = sld [smem:[#allocation19_spill]]  ;;  %s1561_s10 = smov %s1227_s11 }
 0x481   : > { %p22_p2 = scmp.ge.s32.totalorder %s1558_s12, 6  }
 0x482   : > { %s1562_s11 = smov %s1559_s16 }
 0x483   :  { %24 = sbr.rel (!%p22_p2) target bundleno = 11 (0xb), region = 119 }
 0x488   :  { %748 = vsyncpa [#allocation3], 1 }
 0x489   :  { %750 = vsyncpa [#allocation3 + $0x1], 1 }
 0x48a   :  { %751 = vsyncpa [#allocation6], 1 }
 0x48b   :  { %752 = vsyncpa [#allocation9], 1 }
 0x48c   :  { %753 = vsyncpa [#allocation4], 1 }
 0x48d   :  { %755 = vsyncpa [#allocation4 + $0x1], 1 }

</bundles_post_ra>
